<compile_context>
chip_gen: v7x
topology: tpu7x:2x2x1
jax: 0.10.0
libtpu: 0.0.40
codegen_flags: <defaults>
</compile_context>

<pallas_src>
import functools
import numpy as np

import jax
import jax.numpy as jnp
from jax import lax
from jax.experimental import pallas as pl
from jax.experimental.pallas import tpu as pltpu

from scipy.optimize import linear_sum_assignment  # Hungarian assignment (host side)

# ----------------------------------------------------------------------------- config
NUM_PROPOSALS = 8
NUM_THING_CLASSES = 3
NUM_STUFF_CLASSES = 2
NUM_CLASSES = NUM_THING_CLASSES + NUM_STUFF_CLASSES   # 5
IGNORE_LABEL = 255

RANK_W, SEG_W, MASK_W, DICE_W, CLS_W, INST_W = 0.1, 1.0, 1.0, 1.0, 2.0, 1.0
FOCAL_ALPHA, FOCAL_GAMMA = 0.25, 2.0
INST_TEMP = 0.3
SOFTMAX_MASKING_CONSTANT = -99999.0

PIXEL_TILE_TARGET = 32768      # pixel-axis tile target (multiple of 128)
INST_COL_TILE_TARGET = 256     # sample-column tile for the inst-disc similarity
VMEM_BLOCK_BUDGET = 12 * 1024 * 1024   # per-kernel double-buffered input-block budget
NEG_PAD = -1.0e4               # pad logit: sigmoid()==0 and softplus()==0 exactly in f32


# --------------------------------------------------------------------------- helpers
def _round_up(x, m):
    return ((x + m - 1) // m) * m


def _tile_cap(bytes_per_pixel):
    """Largest pixel tile (mult. of 128) whose double-buffered blocks fit the budget."""
    cap = VMEM_BLOCK_BUDGET // (2 * max(int(bytes_per_pixel), 1))
    return max(128, (cap // 128) * 128)


def _pixel_tiling(total, target):
    """Pixel-axis tile (multiple of 128) and padded total.

    Prefers a tile that divides `total` exactly so no jnp.pad HBM copy is needed
    (the common case: H*W is a multiple of 128)."""
    target = max(128, (target // 128) * 128)
    if total <= target:
        tile = _round_up(total, 128)
        return tile, tile
    if total % 128 == 0:
        t = target
        while t >= 1024:
            if total % t == 0:
                return t, total
            t -= 128
    return target, _round_up(total, target)


def _pick_div_tile(total, target):
    """Largest tile <= target (halving from target, floor 128) dividing `total`."""
    t = min(target, total)
    while t > 128 and total % t != 0:
        t //= 2
    return t


# ----------------------------------------------------------------------- Pallas kernels
def _pixel_ce_kernel(logits_ref, labels_ref, out_ref, acc_ref, *, ignore_label):
    """Masked softmax-CE summed over a pixel tile, accumulated per image in scratch.

    logits block: (1, K, TILE) f32   labels block: (1, 1, TILE) int32
    out block   : (1, 1, 1)    f32   written only on the last pixel tile.
    """
    t = pl.program_id(1)

    @pl.when(t == 0)
    def _():
        acc_ref[...] = jnp.zeros_like(acc_ref)

    logits = logits_ref[0]                                          # (K, T)
    labels = labels_ref[0]                                          # (1, T)
    m = jnp.max(logits, axis=0, keepdims=True)
    lse = m + jnp.log(jnp.sum(jnp.exp(logits - m), axis=0, keepdims=True))   # (1, T)
    cls_ids = lax.broadcasted_iota(jnp.int32, logits.shape, 0)
    tgt = jnp.sum(jnp.where(cls_ids == labels, logits, 0.0), axis=0, keepdims=True)
    valid = (labels != ignore_label).astype(jnp.float32)
    acc_ref[...] += jnp.sum((lse - tgt) * valid, axis=1, keepdims=True)

    @pl.when(t == pl.num_programs(1) - 1)
    def _():
        out_ref[...] = acc_ref[...][None]


def pixel_ce_per_image(logits_nkp, labels_n1p):
    """Per-image masked softmax-CE sums. logits (N,K,P), labels (N,1,P) -> (N,1,1)."""
    N, K, P0 = logits_nkp.shape
    tile, Pp = _pixel_tiling(P0, min(PIXEL_TILE_TARGET, _tile_cap((K + 1) * 4)))
    if Pp != P0:  # rare: only when P0 is not a multiple of 128
        logits_nkp = jnp.pad(logits_nkp, ((0, 0), (0, 0), (0, Pp - P0)))
        labels_n1p = jnp.pad(labels_n1p, ((0, 0), (0, 0), (0, Pp - P0)),
                             constant_values=IGNORE_LABEL)
    T = Pp // tile
    kern = functools.partial(_pixel_ce_kernel, ignore_label=IGNORE_LABEL)
    return pl.pallas_call(
        kern,
        out_shape=jax.ShapeDtypeStruct((N, 1, 1), jnp.float32),
        grid=(N, T),
        in_specs=[pl.BlockSpec((1, K, tile), lambda b, p: (b, 0, p)),
                  pl.BlockSpec((1, 1, tile), lambda b, p: (b, 0, p))],
        out_specs=pl.BlockSpec((1, 1, 1), lambda b, p: (b, 0, 0)),
        scratch_shapes=[pltpu.VMEM((1, 1), jnp.float32)],
        compiler_params=pltpu.CompilerParams(
            dimension_semantics=("parallel", "arbitrary"),
            vmem_limit_bytes=32 * 1024 * 1024),
    )(logits_nkp, labels_n1p.astype(jnp.int32))


def _cost_kernel(mask_ref, gt_ref, sumt_ref, cls_ref, out_ref, inter_acc, sump_acc,
                 *, mask_w, dice_w, cls_w, hw_real, n_stages):
    """Hungarian cost, pixel-tiled, ALL decoder stages per tile (GT read once)."""
    t = pl.program_id(1)

    @pl.when(t == 0)
    def _():
        inter_acc[...] = jnp.zeros_like(inter_acc)
        sump_acc[...] = jnp.zeros_like(sump_acc)

    g = gt_ref[0]                                                   # (Mp, TILE) bf16
    for s in range(n_stages):                                       # static unroll
        x = mask_ref[s, 0]                                          # (C, TILE) f32
        p = jax.nn.sigmoid(x)
        inter_acc[s] += lax.dot_general(                            # bf16 MXU, f32 acc
            p.astype(jnp.bfloat16), g, (((1,), (1,)), ((), ())),
            preferred_element_type=jnp.float32)                     # (C, Mp)
        sump_acc[s] += jnp.sum(p, axis=1, keepdims=True)            # (C, 1)

    @pl.when(t == pl.num_programs(1) - 1)
    def _():
        st = sumt_ref[0]                                            # (1, Mp)
        for s in range(n_stages):
            inter = inter_acc[s]
            sum_p = sump_acc[s]
            # sigmoid-CE cost with omit_log (linear in sigmoid); carries a constant
            # -1 offset vs. (sum_p+sum_t-2*inter)/HW -- harmless for the assignment.
            mask_cost = -(2.0 * inter - sum_p - st + hw_real) / hw_real
            denom = sum_p + st
            denom = jnp.where(denom == 0.0, 1.0, denom)
            dice_cost = 1.0 - 2.0 * inter / denom                   # omit_constant
            out_ref[s, 0] = (mask_w * mask_cost + dice_w * dice_cost
                             + cls_w * cls_ref[s, 0])


def matcher_cost_all(mask_logits, gt_masks_pad, cls_cost, hw_real):
    """Cost matrices for ALL decoder stages in one call.

    mask_logits (S,N,C,HW) f32, gt_masks_pad (N,Mp,HW) f32 0/1, cls_cost (S,N,C,Mp).
    """
    S, N, C, HW = mask_logits.shape
    Mp = gt_masks_pad.shape[1]
    sum_t = jnp.sum(gt_masks_pad, axis=-1)[:, None, :]              # (N,1,Mp) exact areas
    tile, HWp = _pixel_tiling(HW, min(PIXEL_TILE_TARGET, _tile_cap(S * C * 4 + Mp * 2)))
    if HWp != HW:  # rare fallback
        mask_logits = jnp.pad(mask_logits, ((0, 0), (0, 0), (0, 0), (0, HWp - HW)),
                              constant_values=NEG_PAD)
        gt_masks_pad = jnp.pad(gt_masks_pad, ((0, 0), (0, 0), (0, HWp - HW)))
    gt_bf16 = gt_masks_pad.astype(jnp.bfloat16)                     # exact 0/1
    T = HWp // tile
    kern = functools.partial(_cost_kernel, mask_w=MASK_W, dice_w=DICE_W, cls_w=CLS_W,
                             hw_real=float(hw_real), n_stages=S)
    return pl.pallas_call(
        kern,
        out_shape=jax.ShapeDtypeStruct((S, N, C, Mp), jnp.float32),
        grid=(N, T),
        in_specs=[pl.BlockSpec((S, 1, C, tile), lambda n, t: (0, n, 0, t)),
                  pl.BlockSpec((1, Mp, tile), lambda n, t: (n, 0, t)),
                  pl.BlockSpec((1, 1, Mp), lambda n, t: (n, 0, 0)),
                  pl.BlockSpec((S, 1, C, Mp), lambda n, t: (0, n, 0, 0))],
        out_specs=pl.BlockSpec((S, 1, C, Mp), lambda n, t: (0, n, 0, 0)),
        scratch_shapes=[pltpu.VMEM((S, C, Mp), jnp.float32),
                        pltpu.VMEM((S, C, 1), jnp.float32)],
        compiler_params=pltpu.CompilerParams(
            dimension_semantics=("parallel", "arbitrary"),
            vmem_limit_bytes=32 * 1024 * 1024),
    )(mask_logits, gt_bf16, sum_t, cls_cost)


def _mask_dice_kernel(src_ref, tgt_ref, valid_ref, bce_ref, dice_ref,
                      bce_acc, inter_acc, sump_acc, sumt_acc):
    """BCE-with-logits + dice sums over matched masks; stage = parallel grid axis."""
    t = pl.program_id(1)

    @pl.when(t == 0)
    def _():
        bce_acc[...] = jnp.zeros_like(bce_acc)
        inter_acc[...] = jnp.zeros_like(inter_acc)
        sump_acc[...] = jnp.zeros_like(sump_acc)
        sumt_acc[...] = jnp.zeros_like(sumt_acc)

    x = src_ref[0]                                    # (Mr, TILE) f32
    tm = tgt_ref[0].astype(jnp.float32)               # (Mr, TILE)
    v = valid_ref[0]                                  # (Mr, 1)
    e = jnp.exp(-jnp.abs(x))                          # shared transcendental
    bce = (jnp.maximum(x, 0.0) - x * tm + jnp.log1p(e)) * v
    bce_acc[...] += jnp.sum(jnp.sum(bce, axis=1, keepdims=True), axis=0, keepdims=True)

    r = pl.reciprocal(1.0 + e, approx=True)           # EUP, keeps the divide off the VALU
    p = jnp.where(x >= 0.0, r, e * r)                 # sigmoid from the shared exp
    inter_acc[...] += jnp.sum(p * tm, axis=1, keepdims=True)
    sump_acc[...] += jnp.sum(p, axis=1, keepdims=True)
    sumt_acc[...] += jnp.sum(tm, axis=1, keepdims=True)

    @pl.when(t == pl.num_programs(1) - 1)
    def _():
        bce_ref[...] = bce_acc[...][None]
        dice = (1.0 - (2.0 * inter_acc[...] + 1.0)
                / (sump_acc[...] + sumt_acc[...] + 1.0)) * v
        dice_ref[...] = jnp.sum(dice, axis=0, keepdims=True)[None]


def mask_dice_sums_all(src_masks, tgt_masks, m_valid):
    """src (S,Mr,HW) logits, tgt (S,Mr,HW) 0/1, m_valid real rows -> per-stage sums."""
    S, Mr, HW = src_masks.shape
    tile, HWp = _pixel_tiling(HW, min(PIXEL_TILE_TARGET, _tile_cap(Mr * 6)))
    if HWp != HW:  # rare fallback
        src_masks = jnp.pad(src_masks, ((0, 0), (0, 0), (0, HWp - HW)),
                            constant_values=NEG_PAD)
        tgt_masks = jnp.pad(tgt_masks, ((0, 0), (0, 0), (0, HWp - HW)))
    tgt_bf = tgt_masks.astype(jnp.bfloat16)
    valid = jnp.broadcast_to(
        (jnp.arange(Mr) < m_valid).astype(jnp.float32)[None, :, None], (S, Mr, 1))
    T = HWp // tile
    bce, dice = pl.pallas_call(
        _mask_dice_kernel,
        out_shape=(jax.ShapeDtypeStruct((S, 1, 1), jnp.float32),
                   jax.ShapeDtypeStruct((S, 1, 1), jnp.float32)),
        grid=(S, T),
        in_specs=[pl.BlockSpec((1, Mr, tile), lambda s, t: (s, 0, t)),
                  pl.BlockSpec((1, Mr, tile), lambda s, t: (s, 0, t)),
                  pl.BlockSpec((1, Mr, 1), lambda s, t: (s, 0, 0))],
        out_specs=(pl.BlockSpec((1, 1, 1), lambda s, t: (s, 0, 0)),
                   pl.BlockSpec((1, 1, 1), lambda s, t: (s, 0, 0))),
        scratch_shapes=[pltpu.VMEM((1, 1), jnp.float32),
                        pltpu.VMEM((Mr, 1), jnp.float32),
                        pltpu.VMEM((Mr, 1), jnp.float32),
                        pltpu.VMEM((Mr, 1), jnp.float32)],
        compiler_params=pltpu.CompilerParams(
            dimension_semantics=("parallel", "arbitrary"),
            vmem_limit_bytes=32 * 1024 * 1024),
    )(src_masks, tgt_bf, valid)
    return bce[:, 0, 0], dice[:, 0, 0]


def _inst_disc_kernel(gt_ref, pr_ref, out_ref, inv_norm, acc, *, temp, tk, k_real, kp):
    """Instance-discrimination soft-target CE, tiled over sample columns.

    Never materializes the full (k,k) similarity matrices; per column tile it builds
    (k,TK) slabs only, the per-row GT normalizer is hoisted to a (kp,1) scratch at
    j==0, and the loss is composed without a loss_mat temporary.
    """
    j = pl.program_id(1)

    @pl.when(j == 0)
    def _():
        acc[...] = jnp.zeros_like(acc)
        # loop-invariant per-row GT normalizer (once per image):
        g32 = gt_ref[0].astype(jnp.float32)                         # (Mp, kp)
        a_vec = jnp.sum(g32, axis=1, keepdims=True)                 # (Mp, 1) GT areas
        norm = lax.dot_general(g32, a_vec, (((0,), (0,)), ((), ())),
                               preferred_element_type=jnp.float32)  # (kp, 1)
        inv_norm[...] = jnp.where(norm == 0.0, 1.0, 1.0 / norm)

    g_full = gt_ref[0]                                              # (Mp, kp) bf16
    f_full = pr_ref[0]                                              # (Cf, kp) bf16
    col0 = pl.multiple_of(j * tk, tk)
    g_cols = gt_ref[:, :, pl.ds(col0, tk)][0]                       # (Mp, TK) bf16
    f_cols = pr_ref[:, :, pl.ds(col0, tk)][0]                       # (Cf, TK) bf16

    gt_sim = lax.dot_general(g_full, g_cols, (((0,), (0,)), ((), ())),
                             preferred_element_type=jnp.float32)    # (kp, TK)
    pred_sim = lax.dot_general(f_full, f_cols, (((0,), (0,)), ((), ())),
                               preferred_element_type=jnp.float32) * (1.0 / temp)
    if kp != k_real:  # mask padded sample rows out of the softmax (static branch)
        row_ids = lax.broadcasted_iota(jnp.int32, pred_sim.shape, 0)
        pred_sim = jnp.where(row_ids < k_real, pred_sim, SOFTMAX_MASKING_CONSTANT)

    gt_norm = gt_sim * inv_norm[...]                                # (kp, TK)

    m = jnp.max(pred_sim, axis=0, keepdims=True)                    # (1, TK)
    lse = m + jnp.log(jnp.sum(jnp.exp(pred_sim - m), axis=0, keepdims=True))
    # sum_rows(gt_norm*(lse - pred_sim)) without a (kp,TK) loss_mat temp:
    w_col = jnp.sum(gt_norm, axis=0, keepdims=True)                 # (1, TK)
    dot_col = jnp.sum(gt_norm * pred_sim, axis=0, keepdims=True)    # (1, TK)
    acc[...] += jnp.sum(lse * w_col - dot_col, axis=1, keepdims=True)

    @pl.when(j == pl.num_programs(1) - 1)
    def _():
        out_ref[...] = acc[...][None]


def inst_disc_total(gt_sampled_bf16, pred_sampled_bf16, k_real):
    """gt (N,Mp,k) bf16 0/1, pred (N,Cf,k) bf16; returns summed soft-target CE."""
    N, Mp, k = gt_sampled_bf16.shape
    Cf = pred_sampled_bf16.shape[1]
    kp = _round_up(k, 128)
    if kp != k:  # padded columns contribute exactly zero (gt rows are all-zero there)
        gt_sampled_bf16 = jnp.pad(gt_sampled_bf16, ((0, 0), (0, 0), (0, kp - k)))
        pred_sampled_bf16 = jnp.pad(pred_sampled_bf16, ((0, 0), (0, 0), (0, kp - k)))
    tk = _pick_div_tile(kp, INST_COL_TILE_TARGET)
    T = kp // tk
    kern = functools.partial(_inst_disc_kernel, temp=INST_TEMP, tk=tk,
                             k_real=k_real, kp=kp)
    out = pl.pallas_call(
        kern,
        out_shape=jax.ShapeDtypeStruct((N, 1, 1), jnp.float32),
        grid=(N, T),
        in_specs=[pl.BlockSpec((1, Mp, kp), lambda b, j: (b, 0, 0)),
                  pl.BlockSpec((1, Cf, kp), lambda b, j: (b, 0, 0))],
        out_specs=pl.BlockSpec((1, 1, 1), lambda b, j: (b, 0, 0)),
        scratch_shapes=[pltpu.VMEM((kp, 1), jnp.float32),
                        pltpu.VMEM((1, 1), jnp.float32)],
        compiler_params=pltpu.CompilerParams(
            dimension_semantics=("parallel", "arbitrary"),
            # TK=256 keeps live (kp,TK) f32 slabs ~12-16 MiB at kp=4096; 40 MiB scoped
            # fits v7x's 64 MiB physical with headroom and is fine on v5e/v6e.
            vmem_limit_bytes=40 * 1024 * 1024),
    )(gt_sampled_bf16, pred_sampled_bf16)
    return jnp.sum(out)


# ----------------------------------------------------------------------------- losses
def seg_loss(seg_pred, seg_target):
    # seg_pred: (N, K, H, W) logits, seg_target: (N, H, W) int
    N, K, H, W = seg_pred.shape
    HW = H * W
    logits = seg_pred.reshape(N, K, HW)                       # free reshape
    labels = seg_target.reshape(N, 1, HW).astype(jnp.int32)
    num_dense_pos = jnp.maximum(
        jnp.sum(((seg_target >= 0) & (seg_target < K)).astype(jnp.float32)), 1.0)
    # TODO(synk): deeplab_ce_loss top-k hard-pixel-mining variant not reproduced
    # (exact definition unavailable); plain masked CE summed / avg_factor is used.
    ce = pixel_ce_per_image(logits, labels)                   # (N, 1, 1)
    return SEG_W * jnp.sum(ce) / num_dense_pos


def cls_loss_all(cls_preds, labels_full, num_masks):
    # Tiny (S,N,C,K) sigmoid focal loss for all stages at once: plain jnp.
    K = cls_preds.shape[-1]
    t = jax.nn.one_hot(labels_full, K, dtype=jnp.float32)     # label==K -> all-zero row
    x = cls_preds
    p = jax.nn.sigmoid(x)
    bce = jnp.maximum(x, 0.0) - x * t + jnp.log1p(jnp.exp(-jnp.abs(x)))
    pt = (1.0 - p) * t + p * (1.0 - t)
    fw = (FOCAL_ALPHA * t + (1.0 - FOCAL_ALPHA) * (1.0 - t)) * pt ** FOCAL_GAMMA
    per_stage = jnp.sum(bce * fw, axis=(1, 2, 3)) / num_masks
    return CLS_W * per_stage                                  # (S,)


def focal_class_cost(cls_preds, labels_pad):
    """Focal-style classification cost gathered at (padded) GT labels, on device."""
    S, N, C, K = cls_preds.shape
    Mp = labels_pad.shape[1]
    cp = jax.nn.sigmoid(cls_preds)
    eps = 1e-12
    neg = -jnp.log(1.0 - cp + eps) * (1.0 - FOCAL_ALPHA) * cp ** FOCAL_GAMMA
    pos = -jnp.log(cp + eps) * FOCAL_ALPHA * (1.0 - cp) ** FOCAL_GAMMA
    full = pos - neg                                                 # (S, N, C, K)
    idx = jnp.broadcast_to(labels_pad[None, :, None, :].astype(jnp.int32), (S, N, C, Mp))
    return jnp.take_along_axis(full, idx, axis=-1)                   # (S, N, C, Mp)


def instance_discrimination_loss(feature_map, gt_masks_pad, key):
    # feature_map: (N, Cf, H, W); gt_masks_pad: (N, Mp, H*W) zero-padded GT masks (0/1)
    N, Cf, H, W = feature_map.shape
    HW = H * W
    norm = jnp.sqrt(jnp.sum(feature_map ** 2, axis=1, keepdims=True))
    fm = (feature_map / jnp.maximum(norm, 1e-12)).reshape(N, Cf, HW)
    tm = jnp.round(gt_masks_pad)                                  # (N, Mp, HW)
    area = jnp.sum(tm, axis=-1)                                   # (N, Mp)
    area_pix = jnp.einsum('bn,bnp->bp', area, tm)                 # (N, HW)
    area_pix = jnp.where(area_pix == 0.0, 1.0, area_pix)
    inv_area = HW / area_pix
    non_void = jnp.where(jnp.sum(tm, axis=1) == 0.0, 0.0, 1.0)    # (N, HW)
    # TODO(synk): original sample_k is fixed at 4096; clipped to H*W for small shapes.
    k_sample = min(4096, HW)
    sample_logits = jnp.log(inv_area) * INST_TEMP + (1.0 - non_void) * SOFTMAX_MASKING_CONSTANT
    u = jax.random.uniform(key, sample_logits.shape, minval=1e-20, maxval=1.0)
    gumbel = -jnp.log(-jnp.log(u))
    _, idx = lax.top_k(sample_logits + gumbel, k_sample)          # (N, k)
    gt_sampled = jnp.take_along_axis(tm, idx[:, None, :], axis=-1)      # (N, Mp, k)
    pred_sampled = jnp.take_along_axis(fm, idx[:, None, :], axis=-1)    # (N, Cf, k)
    total = inst_disc_total(gt_sampled.astype(jnp.bfloat16),
                            pred_sampled.astype(jnp.bfloat16), k_sample)
    return INST_W * total / (N * k_sample)


# ----------------------------------------------------------------------------- forward
def rtknet_criterion_forward(outputs, targets, key):
    gt_labels_list = [np.asarray(t['labels']) for t in targets['instances']]
    gt_masks_list = [np.asarray(t['masks'], np.float32) for t in targets['instances']]
    # TODO(synk): distributed all_reduce of num_masks not reproduced (single host).
    num_masks = float(sum(len(l) for l in gt_labels_list))

    seg_pred = outputs['seg_mask_pred']
    N = seg_pred.shape[0]
    H, W = gt_masks_list[0].shape[1:]
    HW = H * W

    # shared zero-padded GT masks / labels (host -> device upload only; no sync back)
    max_m = max(m.shape[0] for m in gt_masks_list)
    Mp = max(8, _round_up(max_m, 8))
    gt_pad_np = np.zeros((N, Mp, HW), np.float32)
    labels_pad_np = np.zeros((N, Mp), np.int32)
    for b in range(N):
        m_b = gt_masks_list[b].shape[0]
        gt_pad_np[b, :m_b] = gt_masks_list[b].reshape(m_b, HW)
        labels_pad_np[b, :m_b] = gt_labels_list[b]
    gt_masks_pad = jnp.asarray(gt_pad_np)              # (N, Mp, HW) f32 0/1
    labels_pad = jnp.asarray(labels_pad_np)            # (N, Mp) int32

    losses = {'loss_seg': seg_loss(seg_pred, targets['sem_seg'])}
    if INST_W > 0:
        losses['loss_inst_disc'] = instance_discrimination_loss(
            outputs['feature_map'], gt_masks_pad, key)

    # ---- all decoder stages: matching costs in ONE pallas dispatch, then a single
    #      device->host sync for the scipy Hungarian solve ----
    S = len(outputs['outputs'])
    C = outputs['outputs'][0]['pred_masks'].shape[1]
    mask_preds = jnp.stack([o['pred_masks'] for o in outputs['outputs']], 0).reshape(S, N, C, HW)
    cls_preds = jnp.stack([o['pred_logits'] for o in outputs['outputs']], 0)      # (S, N, C, K)
    cls_cost = focal_class_cost(cls_preds, labels_pad)                            # (S, N, C, Mp)
    cost = matcher_cost_all(mask_preds, gt_masks_pad, cls_cost, HW)
    cost_np = np.asarray(cost)                                                    # one host sync

    # ---- Hungarian per (stage, image) on host; build all index bookkeeping ----
    M_total = int(sum(m.shape[0] for m in gt_masks_list))
    Mpm = max(8, _round_up(max(M_total, 1), 8))
    labels_full_np = np.full((S, N, C), NUM_CLASSES, np.int32)
    perm_np = np.zeros((S, N, C, Mp), np.float32)
    bi_np = np.zeros((S, Mpm), np.int32)   # padded gather indices (dummy rows -> (0,0))
    ci_np = np.zeros((S, Mpm), np.int32)
    ti_np = np.zeros((S, Mpm), np.int32)
    for s in range(S):
        m_ptr = 0
        for b in range(N):
            m_b = gt_masks_list[b].shape[0]
            r, c_ = linear_sum_assignment(cost_np[s, b, :, :m_b])
            labels_full_np[s, b, r] = gt_labels_list[b][c_]
            perm_np[s, b, r, c_] = 1.0
            nb = len(r)
            bi_np[s, m_ptr:m_ptr + nb] = b
            ci_np[s, m_ptr:m_ptr + nb] = r
            ti_np[s, m_ptr:m_ptr + nb] = c_
            m_ptr += nb

    # ---- per-stage losses, each fused over all stages ----
    # classification focal loss (tiny, plain jnp)
    cls_losses = cls_loss_all(cls_preds, jnp.asarray(labels_full_np), max(num_masks, 1.0))

    # matched-mask BCE + dice: one kernel for all stages (stage axis parallel)
    bi = jnp.asarray(bi_np); ci = jnp.asarray(ci_np); ti = jnp.asarray(ti_np)
    s_ix = jnp.arange(S)[:, None]
    src_masks = mask_preds[s_ix, bi, ci]                              # (S, Mpm, HW)
    tgt_masks = gt_masks_pad[bi, ti]                                  # (S, Mpm, HW)
    bce_s, dice_s = mask_dice_sums_all(src_masks, tgt_masks, M_total)

    # rank loss: per-pixel CE over proposal channels, all stages in one kernel
    mask_targets = jnp.einsum('sbcm,bmp->sbcp', jnp.asarray(perm_np), gt_masks_pad)
    bg = jnp.full((S, N, 1, HW), 0.5, jnp.float32)
    rank_target = jnp.argmax(jnp.concatenate([mask_targets, bg], axis=2), axis=2)
    rank_target = rank_target.astype(jnp.int32)                       # (S, N, HW)
    ignore_val = jnp.max(rank_target, axis=(1, 2), keepdims=True)     # per-stage max()
    rank_labels = jnp.where(rank_target == ignore_val, IGNORE_LABEL, rank_target)
    rank_ce = pixel_ce_per_image(mask_preds.reshape(S * N, C, HW),
                                 rank_labels.reshape(S * N, 1, HW))   # (S*N, 1, 1)
    rank_sums = jnp.sum(rank_ce.reshape(S, N), axis=1)                # (S,)

    m_den = float(max(M_total, 1))
    for s in range(S):
        losses[f's{s + 1}_loss_cls'] = cls_losses[s]
        losses[f's{s + 1}_loss_mask'] = MASK_W * bce_s[s] / (m_den * HW)
        losses[f's{s + 1}_loss_dice'] = DICE_W * dice_s[s] / m_den
        # reference uses reduction='none' + .mean() over all N*H*W pixels
        losses[f's{s + 1}_loss_rank'] = RANK_W * rank_sums[s] / float(N * HW)
    return losses


# ------------------------------------------------------------------------------- main
if __name__ == "__main__":
    key = jax.random.PRNGKey(0)
    ks = jax.random.split(key, 10)
    N, H, W = 2, 16, 16
    C, K, Cf = NUM_PROPOSALS, NUM_CLASSES, 32

    seg_pred = jax.random.normal(ks[0], (N, K, H, W), jnp.float32)
    feature_map = jax.random.normal(ks[1], (N, Cf, H, W), jnp.float32)
    stages = []
    for s in range(2):
        stages.append({
            'pred_masks': jax.random.normal(ks[2 + s], (N, C, H, W), jnp.float32),
            'pred_logits': jax.random.normal(ks[4 + s], (N, C, K), jnp.float32),
        })
    outputs = {'seg_mask_pred': seg_pred, 'feature_map': feature_map, 'outputs': stages}

    seg_target = jax.random.randint(ks[6], (N, H, W), 0, K).astype(jnp.int32)
    ign_mask = jax.random.bernoulli(ks[7], 0.1, (N, H, W))
    seg_target = jnp.where(ign_mask, IGNORE_LABEL, seg_target)

    rng = np.random.RandomState(0)
    num_gt = [3, 4]
    instances = []
    for b in range(N):
        M = num_gt[b]
        masks = (rng.rand(M, H, W) > 0.7).astype(np.float32)
        labels = rng.randint(0, K, size=(M,)).astype(np.int64)
        instances.append({'labels': labels, 'masks': masks})
    targets = {'sem_seg': seg_target, 'instances': instances}

    losses = rtknet_criterion_forward(outputs, targets, ks[8])
    losses = jax.block_until_ready(losses)
    print("KERNEL_OK")
</pallas_src>

<mosaic_0001>
module attributes {stable_mosaic.version = 11 : i64} {
  func.func @_pixel_ce_kernel(%arg0: i32, %arg1: i32, %arg2: memref<1x5x256xf32, #tpu.memory_space<vmem>>, %arg3: memref<1x1x256xi32, #tpu.memory_space<vmem>>, %arg4: memref<1x1x1xf32, #tpu.memory_space<vmem>>, %arg5: memref<1x1xf32, #tpu.memory_space<vmem>>) attributes {dimension_semantics = [#tpu.dimension_semantics<parallel>, #tpu.dimension_semantics<arbitrary>], iteration_bounds = array<i64: 2, 1>, scalar_prefetch = 0 : i64, scratch_operands = 1 : i64, tpu.core_type = #tpu.core_type<tc>, window_params = [{transform_indices = @transform_0, window_bounds = array<i64: 1, 5, 256>}, {transform_indices = @transform_1, window_bounds = array<i64: 1, 1, 256>}, {transform_indices = @transform_2, window_bounds = array<i64: 1, 1, 1>}]} {
    %c0_i32 = arith.constant 0 : i32
    %0 = arith.cmpi eq, %arg1, %c0_i32 : i32
    %1 = arith.extui %0 : i1 to i32
    %c0_i32_0 = arith.constant 0 : i32
    %2 = arith.cmpi ne, %1, %c0_i32_0 : i32
    scf.if %2 {
      %cst_16 = arith.constant 0.000000e+00 : f32
      %37 = vector.broadcast %cst_16 : f32 to vector<1x1xf32>
      %c0_17 = arith.constant 0 : index
      %c0_18 = arith.constant 0 : index
      %38 = vector.load %arg5[%c0_17, %c0_18] : memref<1x1xf32, #tpu.memory_space<vmem>>, vector<1x1xf32>
      tpu.vector_store %arg5[%c0_17, %c0_18], %37 {strides = array<i32>} : memref<1x1xf32, #tpu.memory_space<vmem>>, vector<1x1xf32>,
    } else {
    }
    %c0 = arith.constant 0 : index
    %c0_1 = arith.constant 0 : index
    %c0_2 = arith.constant 0 : index
    %3 = vector.load %arg2[%c0, %c0_1, %c0_2] : memref<1x5x256xf32, #tpu.memory_space<vmem>>, vector<1x5x256xf32>
    %4 = vector.shape_cast %3 : vector<1x5x256xf32> to vector<5x256xf32>
    %c0_3 = arith.constant 0 : index
    %c0_4 = arith.constant 0 : index
    %c0_5 = arith.constant 0 : index
    %5 = vector.load %arg3[%c0_3, %c0_4, %c0_5] : memref<1x1x256xi32, #tpu.memory_space<vmem>>, vector<1x1x256xi32>
    %6 = vector.shape_cast %5 : vector<1x1x256xi32> to vector<1x256xi32>
    %cst = arith.constant dense<0xFF800000> : vector<256xf32>
    %7 = vector.multi_reduction <maximumf>, %4, %cst [0] : vector<5x256xf32> to vector<256xf32>
    %8 = vector.shape_cast %7 : vector<256xf32> to vector<1x256xf32>
    %9 = vector.broadcast %8 : vector<1x256xf32> to vector<5x256xf32>
    %10 = arith.subf %4, %9 : vector<5x256xf32>
    %11 = math.exp %10 : vector<5x256xf32>
    %cst_6 = arith.constant dense<0.000000e+00> : vector<256xf32>
    %12 = vector.multi_reduction <add>, %11, %cst_6 [0] : vector<5x256xf32> to vector<256xf32>
    %13 = vector.shape_cast %12 : vector<256xf32> to vector<1x256xf32>
    %14 = math.log %13 : vector<1x256xf32>
    %15 = arith.addf %8, %14 : vector<1x256xf32>
    %16 = tpu.iota {dimensions = array<i32: 0>} : vector<5x256xi32>
    %17 = vector.broadcast %6 : vector<1x256xi32> to vector<5x256xi32>
    %18 = arith.cmpi eq, %16, %17 : vector<5x256xi32>
    %cst_7 = arith.constant 0.000000e+00 : f32
    %19 = vector.broadcast %cst_7 : f32 to vector<5x256xf32>
    %20 = arith.select %18, %4, %19 : vector<5x256xi1>, vector<5x256xf32>
    %cst_8 = arith.constant dense<0.000000e+00> : vector<256xf32>
    %21 = vector.multi_reduction <add>, %20, %cst_8 [0] : vector<5x256xf32> to vector<256xf32>
    %22 = vector.shape_cast %21 : vector<256xf32> to vector<1x256xf32>
    %c255_i32 = arith.constant 255 : i32
    %23 = vector.broadcast %c255_i32 : i32 to vector<1x256xi32>
    %24 = arith.cmpi ne, %6, %23 : vector<1x256xi32>
    %25 = arith.extui %24 : vector<1x256xi1> to vector<1x256xi32>
    %26 = arith.sitofp %25 : vector<1x256xi32> to vector<1x256xf32>
    %c0_9 = arith.constant 0 : index
    %c0_10 = arith.constant 0 : index
    %27 = vector.load %arg5[%c0_9, %c0_10] : memref<1x1xf32, #tpu.memory_space<vmem>>, vector<1x1xf32>
    %28 = arith.subf %15, %22 : vector<1x256xf32>
    %29 = arith.mulf %28, %26 : vector<1x256xf32>
    %cst_11 = arith.constant dense<0.000000e+00> : vector<1xf32>
    %30 = vector.multi_reduction <add>, %29, %cst_11 [1] : vector<1x256xf32> to vector<1xf32>
    %31 = vector.shape_cast %30 : vector<1xf32> to vector<1x1xf32>
    %32 = arith.addf %27, %31 : vector<1x1xf32>
    %c0_12 = arith.constant 0 : index
    %c0_13 = arith.constant 0 : index
    %33 = vector.load %arg5[%c0_12, %c0_13] : memref<1x1xf32, #tpu.memory_space<vmem>>, vector<1x1xf32>
    tpu.vector_store %arg5[%c0_12, %c0_13], %32 {strides = array<i32>} : memref<1x1xf32, #tpu.memory_space<vmem>>, vector<1x1xf32>,
    %c0_i32_14 = arith.constant 0 : i32
    %34 = arith.cmpi eq, %arg1, %c0_i32_14 : i32
    %35 = arith.extui %34 : i1 to i32
    %c0_i32_15 = arith.constant 0 : i32
    %36 = arith.cmpi ne, %35, %c0_i32_15 : i32
    scf.if %36 {
      %c0_16 = arith.constant 0 : index
      %c0_17 = arith.constant 0 : index
      %37 = vector.load %arg5[%c0_16, %c0_17] : memref<1x1xf32, #tpu.memory_space<vmem>>, vector<1x1xf32>
      %38 = vector.shape_cast %37 : vector<1x1xf32> to vector<1x1x1xf32>
      %c0_18 = arith.constant 0 : index
      %c0_19 = arith.constant 0 : index
      %c0_20 = arith.constant 0 : index
      %39 = vector.load %arg4[%c0_18, %c0_19, %c0_20] : memref<1x1x1xf32, #tpu.memory_space<vmem>>, vector<1x1x1xf32>
      tpu.vector_store %arg4[%c0_18, %c0_19, %c0_20], %38 {strides = array<i32>} : memref<1x1x1xf32, #tpu.memory_space<vmem>>, vector<1x1x1xf32>,
    } else {
    }
    return
  }
  func.func @transform_0(%arg0: i32, %arg1: i32) -> (i32, i32, i32) {
    %c0_i32 = arith.constant 0 : i32
    %c0_i32_0 = arith.constant 0 : i32
    return %arg0, %c0_i32, %arg1 : i32, i32, i32
  }
  func.func @transform_1(%arg0: i32, %arg1: i32) -> (i32, i32, i32) {
    %c0_i32 = arith.constant 0 : i32
    %c0_i32_0 = arith.constant 0 : i32
    return %arg0, %c0_i32, %arg1 : i32, i32, i32
  }
  func.func @transform_2(%arg0: i32, %arg1: i32) -> (i32, i32, i32) {
    %c0_i32 = arith.constant 0 : i32
    %c0_i32_0 = arith.constant 0 : i32
    %c0_i32_1 = arith.constant 0 : i32
    return %arg0, %c0_i32, %c0_i32_0 : i32, i32, i32
  }
}

</mosaic_0001>

<bundles_post_ra>
// kernel: tpu_custom_call.1
= control target key start
LH: loop header
LB: loop body
LE: loop exit
PB: predicated region body
PF: predicated region fallthrough
CT: control target
= control target key end

     0   :  { %s473_s9 = smov 0   ;;  %s475_s10 = smov 0   ;;  %s525_s0 = inlined_call_operand.vmem [shape: f32[2,5,256], index: 0, kind: input, shape index: {}]   ;;  %s526_s1 = inlined_call_operand.vmem [shape: s32[2,1,256], index: 1, kind: input, shape index: {}]   ;;  %s527_s2 = inlined_call_operand.vmem [shape: f32[2,1,1], index: 2, kind: output, shape index: {}]  }
   0x1   :  { %s477_s11 = smov 0  }
   0x2 LB: > { %s24_s12 = sadd.s32 1, %s451_s10  ;;  %p392_p0 = scmp.ge.s32.totalorder %s455_s11, 1  ;;  %s455_s11 = sphi %s477_s11, %s12_s11   ;;  %s451_s10 = sphi %s475_s10, %s529_s10   ;;  %s447_s9 = sphi %s473_s9, %s528_s9  }
   0x3   : > { %p26_p1 = scmp.ge.s32.totalorder %s24_s12, 2  ;;  %p147_p2 = scmp.lt.s32.totalorder %s455_s11, 3 }
   0x5   : > { %s531_s12 = smov (%p26_p1, %s24_s12), 0  ;;  %p148_p3 = pnand %p392_p0, %p147_p2 }
   0x6   : > { %p180_p4 = scmp.lt.s32.totalorder (!%p148_p3), %s447_s9, 1  ;;  %vm205_vm0 = vcmask (!%p148_p3), 0   ;;  %v457_v0 = vmov (!%p148_p3), 0.0   ;;  %vm210_vm1 = vcmask (!%p148_p3), 1044480   ;;  %v251_v13 = vlaneseq (!%p148_p3) }
   0x7   : > { %151 = sbr.rel (%p148_p3) target bundleno = 235 (0xeb), region = 28  ;;  %206 = vst.msk [vmem:[#allocation2] sm:$0x1] (!%p148_p3), %vm205_vm0, %v457_v0  ;;  %vm298_vm5 = vcmask (!%p148_p3), 1040384  }
   0x8   : > { %v252_v18 = vshrl.u32 (!%p148_p3), %v251_v13, 7 }
   0xa   : > { %v255_v23 = vsub.s32 (!%p148_p3), 0, %v252_v18  ;;  %v259_v25 = vsub.s32 (!%p148_p3), 1, %v252_v18 }
   0xe   : > { %s533_s9 = smov (!%p180_p4, %s447_s9), 1 }
   0xf   : > { %s399_s13 = sshll.u32 %s533_s9, 4  ;;  %s395_s17 = sshll.u32 %s533_s9, 1 }
  0x10   : > { %s187_s16 = scalar_lea.vmem %s525_s0, %s399_s13  ;;  %s196_s20 = scalar_lea.vmem %s526_s1, %s395_s17 }
  0x11   : > { %v207_v1 = vld [vmem:[%s187_s16] sm:$0x1f]  ;;  %v208_v2 = vld [vmem:[%s187_s16 + $0x8] sm:$0x1f]  ;;  %s200_s23 = scalar_lea.vmem %s527_s2, %s533_s9 }
  0x12   : > { %v211_v3 = vsel %vm210_vm1, %v207_v1, -inf  ;;  %v218_v4 = vsel %vm210_vm1, %v208_v2, -inf  ;;  %v209_v24 = vld [vmem:[%s196_s20] sm:$0x3] }
  0x13   : > { %v212_v5 = vrot.slane %v211_v3, 4  ;;  %v219_v6 = vrot.slane %v218_v4, 4  ;;  %v256_v26 = vrot.slane %v209_v24, %v255_v23  ;;  %v260_v27 = vrot.slane %v209_v24, %v259_v25 }
  0x14   : > { %vm279_vm4 = vcmp.ne.s32.totalorder %v209_v24, 255 }
  0x15   : > { %v213_v7 = vmax.f32 %v211_v3, %v212_v5  ;;  %v220_v8 = vmax.f32 %v218_v4, %v219_v6  ;;  %vm261_vm2 = vcmp.eq.s32.totalorder %v252_v18, %v256_v26  ;;  %vm262_vm3 = vcmp.eq.s32.totalorder %v252_v18, %v260_v27 }
  0x16   : > { %v263_v28 = vsel %vm261_vm2, %v207_v1, 0.0  ;;  %v264_v30 = vsel %vm262_vm3, %v208_v2, 0.0  ;;  %v396_v59 = vsel %vm279_vm4, 1.0, %v457_v0  ;;  %v282_v0 = vld [vmem:[#allocation2] sm:$0x1] }
  0x17   : > { %v214_v9 = vrot.slane %v213_v7, 2  ;;  %v221_v10 = vrot.slane %v220_v8, 2  ;;  %v265_v35 = vsel %vm210_vm1, %v263_v28, 0.0  ;;  %v272_v37 = vsel %vm210_vm1, %v264_v30, 0.0 }
  0x18   : > { %v266_v40 = vrot.slane %v265_v35, 4  ;;  %v273_v42 = vrot.slane %v272_v37, 4  ;;  %v289_v3 = vrot.slane %v396_v59, %v255_v23  ;;  %v293_v5 = vrot.slane %v396_v59, %v259_v25 }
  0x19   : > { %v215_v11 = vmax.f32 %v213_v7, %v214_v9  ;;  %v222_v12 = vmax.f32 %v220_v8, %v221_v10 }
  0x1a   : > { %v267_v46 = vadd.f32 %v266_v40, %v265_v35  ;;  %v274_v48 = vadd.f32 %v273_v42, %v272_v37 }
  0x1b   : > { %v216_v14 = vrot.slane %v215_v11, 1  ;;  %v223_v15 = vrot.slane %v222_v12, 1 }
  0x1c   : > { %v268_v52 = vrot.slane %v267_v46, 2  ;;  %v275_v53 = vrot.slane %v274_v48, 2 }
  0x1d   : > { %v217_v16 = vmax.f32 %v215_v11, %v216_v14  ;;  %v224_v17 = vmax.f32 %v222_v12, %v223_v15 }
  0x1e   : > { %v269_v54 = vadd.f32 %v268_v52, %v267_v46  ;;  %v276_v55 = vadd.f32 %v275_v53, %v274_v48 }
  0x1f   : > { %v225_v19 = vsub.f32 %v207_v1, %v217_v16  ;;  %v226_v20 = vsub.f32 %v208_v2, %v224_v17 }
  0x20   : > { %v270_v56 = vrot.slane %v269_v54, 1  ;;  %v277_v57 = vrot.slane %v276_v55, 1 }
  0x21   : > { %v227_v21 = vmul.f32 1.442695, %v225_v19  ;;  %v229_v22 = vmul.f32 1.442695, %v226_v20 }
  0x22   : > { %v271_v62 = vadd.f32 %v270_v56, %v269_v54  ;;  %v278_v1 = vadd.f32 %v277_v57, %v276_v55 }
  0x23   : > { %425 = vpow2.f32 %v227_v21 }
  0x24   : > { %427 = vpow2.f32 %v229_v22 }
  0x2d   : > { %v426_v29 = vpop.eup %425 }
  0x2e   : > { %v428_v31 = vpop.eup %427  ;;  %v231_v32 = vsel %vm210_vm1, %v426_v29, 0.0 }
  0x2f   : > { %v232_v33 = vrot.slane %v231_v32, 4  ;;  %v238_v34 = vsel %vm210_vm1, %v428_v31, 0.0 }
  0x30   : > { %v239_v36 = vrot.slane %v238_v34, 4 }
  0x31   : > { %v233_v38 = vadd.f32 %v232_v33, %v231_v32 }
  0x32   : > { %v240_v39 = vadd.f32 %v239_v36, %v238_v34 }
  0x33   : > { %v234_v41 = vrot.slane %v233_v38, 2 }
  0x34   : > { %v241_v43 = vrot.slane %v240_v39, 2 }
  0x35   : > { %v235_v44 = vadd.f32 %v234_v41, %v233_v38 }
  0x36   : > { %v242_v45 = vadd.f32 %v241_v43, %v240_v39 }
  0x37   : > { %v236_v47 = vrot.slane %v235_v44, 1 }
  0x38   : > { %v243_v49 = vrot.slane %v242_v45, 1 }
  0x39   : > { %v237_v50 = vadd.f32 %v236_v47, %v235_v44 }
  0x3a   : > { %v244_v51 = vadd.f32 %v243_v49, %v242_v45 }
  0x3b   : > { %429 = vlog2.f32 %v237_v50 }
  0x3c   : > { %431 = vlog2.f32 %v244_v51 }
  0x45   : > { %v430_v58 = vpop.eup %429 }
  0x46   : > { %v432_v60 = vpop.eup %431  ;;  %v246_v61 = vmul.f32 0.6931472, %v430_v58 }
  0x47   : > { %v248_v63 = vmul.f32 0.6931472, %v432_v60 }
  0x48   : > { %v249_v2 = vadd.f32 %v246_v61, %v217_v16 }
  0x49   : > { %v250_v4 = vadd.f32 %v248_v63, %v224_v17 }
  0x4a   : > { %v283_v6 = vsub.f32 %v249_v2, %v271_v62 }
  0x4b   : > { %v284_v7 = vsub.f32 %v250_v4, %v278_v1 }
  0x4c   : > { %v296_v8 = vmul.f32 %v289_v3, %v283_v6 }
  0x4d   : > { %v297_v9 = vmul.f32 %v293_v5, %v284_v7 }
  0x4e   : > { %v299_v10 = vsel %vm298_vm5, %v296_v8, 0.0 }
  0x4f   : > { %v300_v11 = vsel %vm298_vm5, %v297_v9, 0.0 }
  0x50   : > { %v301_v12 = vadd.f32 %v300_v11, %v299_v10 }
  0x52   : > { %302 = vadd.xlane.f32.xlu0 %v301_v12 }
  0xdf   : > { %v303_v13 = vpop.xlane.xlu0 %302 }
  0xe0   : > { %v304_v14 = vadd.f32 %v303_v13, %v282_v0 }
  0xe2   : > { %306 = vst.msk [vmem:[#allocation2] sm:$0x1] %vm205_vm0, %v304_v14 }
  0xe9   : > { %v310_v15 = vld [vmem:[#allocation2] sm:$0x1] }
  0xea   : > { %311 = vst.msk [vmem:[%s200_s23] sm:$0x1] %vm205_vm0, %v310_v15 }
  0xeb PF: > { %s12_s11 = sadd.s32 1, %s455_s11   ;;  %s528_s9 = smov %s451_s10 }
  0xec   : > { %p9_p5 = scmp.ge.s32.totalorder %s12_s11, 4   ;;  %s529_s10 = smov %s531_s12 }
  0xee   :  { %11 = sbr.rel (!%p9_p5) target bundleno = 2 (0x2), region = 69 }

</bundles_post_ra>
